<compile_context>
chip_gen: v5e
topology: v5e:2x2
jax: 0.10.0
libtpu: 0.0.40
codegen_flags: <defaults>
</compile_context>

<pallas_src>
import functools
import math

import jax
import jax.numpy as jnp
from jax.experimental import pallas as pl
from jax.experimental.pallas import tpu as pltpu

EPS = 1e-7  # stand-in for params['EPS'] in the original codebase


def _uniform_entropy_kernel(z_ref, o_ref, *, scale):
    # z_ref: (tb, C, K) in z's native dtype; o_ref: (tb, C) f32.
    # Lane reduce over the codebook axis with f32 accumulation; only the small (tb, C)
    # result is f32 -- the z stream is never promoted in the wrapper.
    o_ref[...] = (jnp.sum(z_ref[...], axis=-1, dtype=jnp.float32) * scale).astype(o_ref.dtype)


def _weighted_entropy_kernel(z_ref, w_ref, o_ref):
    # z_ref: (tb, C, K) native dtype; w_ref: (C, K) f32 = -log(clamp(probs)), resident.
    # Mixed-precision elementwise multiply promotes to f32; reduce over K accumulates f32.
    o_ref[...] = jnp.sum(z_ref[...] * w_ref[...], axis=-1).astype(o_ref.dtype)


def _round_up(x, m):
    return ((x + m - 1) // m) * m


def _tile_and_limits(B, C, K, itemsize):
    """Pick the batch tile and VMEM limit per TPU generation (streaming, HBM-bound)."""
    try:
        vmem_cap = int(pltpu.get_tpu_info().vmem_capacity_bytes)
    except Exception:
        vmem_cap = 64 << 20                       # conservative (v7x-like) fallback
    if vmem_cap >= (100 << 20):                   # v5e / v6e: 128 MiB physical VMEM
        tb_max_bytes, vmem_limit = 12 << 20, 96 << 20
    else:                                         # v7x: 64 MiB physical per TensorCore
        tb_max_bytes, vmem_limit = 8 << 20, 48 << 20

    row_bytes = C * K * itemsize
    pack = max(8, 32 // itemsize)                 # sublane packing: 8 f32 / 16 bf16 / 32 i8
    tb = max(pack, (tb_max_bytes // max(1, row_bytes)) // pack * pack)
    # Guarantee >= 2 grid steps whenever the batch allows it (v7x 2-TC streaming).
    if B >= 2 * pack:
        tb = min(tb, _round_up((B + 1) // 2, pack))
    if tb >= B:
        tb = B                                    # single full-dim block (tiny batches)
    return tb, vmem_limit


def uniform_entropy_coding_forward(z, probs=None, eps=EPS):
    """Forward of UniformEntropyCoding.

    z:     (B, code_dim, codebook_dim), f32/bf16 -- streamed in its native dtype.
    probs: None -> the module's uniform distribution softmax(ones) (fast path);
           otherwise an explicit (1, code_dim, codebook_dim) probability table.
    Returns -sum(z * log(clamp(probs, eps, 1-eps)), axis=2), shape (B, code_dim), f32.
    """
    B, C, K = z.shape
    itemsize = jnp.dtype(z.dtype).itemsize
    out_dtype = jnp.promote_types(z.dtype, jnp.float32)

    tb, vmem_limit = _tile_and_limits(B, C, K, itemsize)
    grid = (pl.cdiv(B, tb),)

    if probs is None:
        # Module semantics: uniform probs -> a single scalar scale baked into the kernel.
        scale = -math.log(min(max(1.0 / K, eps), 1.0 - eps))
        kernel = functools.partial(_uniform_entropy_kernel, scale=scale)
        extra_args, extra_specs, w_bytes = (), [], 0
    else:
        # General path: tiny resident f32 table, exact for arbitrary probs.
        neg_logp = -jnp.log(
            jnp.clip(probs.reshape(C, K).astype(jnp.float32), eps, 1.0 - eps)
        )
        kernel = _weighted_entropy_kernel
        extra_args = (neg_logp,)
        extra_specs = [pl.BlockSpec((C, K), lambda i: (0, 0))]   # resident across batch axis
        w_bytes = 4 * C * K

    cost = pl.CostEstimate(
        flops=2 * B * C * K,
        transcendentals=0,
        bytes_accessed=B * C * K * itemsize + 4 * B * C + w_bytes,
    )
    compiler_params = pltpu.CompilerParams(
        dimension_semantics=("parallel",),        # batch tiles independent -> 2-TC sharding
        vmem_limit_bytes=vmem_limit,
    )
    out_shape = jax.ShapeDtypeStruct((B, C), out_dtype)
    out_spec = pl.BlockSpec((tb, C), lambda i: (i, 0))

    def _run(z_pipeline_mode):
        if z_pipeline_mode is None:
            z_spec = pl.BlockSpec((tb, C, K), lambda i: (i, 0, 0))
        else:
            z_spec = pl.BlockSpec((tb, C, K), lambda i: (i, 0, 0),
                                  pipeline_mode=z_pipeline_mode)
        return pl.pallas_call(
            kernel,
            out_shape=out_shape,
            grid=grid,
            in_specs=[z_spec] + extra_specs,
            out_specs=out_spec,
            compiler_params=compiler_params,
            cost_estimate=cost,
        )(z, *extra_args)

    try:
        # Deeper pipelining on the z stream: compute per step is trivial, steps are
        # back-to-back DMAs, a third buffer hides DMA issue latency.
        return _run(pl.Buffered(3))
    except Exception:
        return _run(None)                         # default double buffering


def make_probs(code_dim, codebook_dim):
    # softmax of ones over the last axis == uniform distribution
    return jax.nn.softmax(jnp.ones((1, code_dim, codebook_dim), jnp.float32), axis=-1)


if __name__ == "__main__":
    # Small shapes consistent with the module: batch=2, code_dim=8, codebook_dim=32
    B, code_dim, codebook_dim = 2, 8, 32

    key = jax.random.PRNGKey(0)
    z = jax.random.uniform(key, (B, code_dim, codebook_dim), dtype=jnp.float32)
    probs = make_probs(code_dim, codebook_dim)

    # Reference in plain JAX (matches the PyTorch forward).
    ref = -jnp.sum(z * jnp.log(jnp.clip(probs, EPS, 1.0 - EPS)), axis=2)

    # Fast path: the module's actual (uniform) probabilities -> scale * rowsum kernel.
    out_uniform = jax.block_until_ready(uniform_entropy_coding_forward(z))
    # General path: explicit probability table (exercised for coverage).
    out_general = jax.block_until_ready(uniform_entropy_coding_forward(z, probs))

    assert out_uniform.shape == (B, code_dim)
    assert out_general.shape == (B, code_dim)
    assert jnp.allclose(out_uniform, ref, atol=1e-4, rtol=1e-5)
    assert jnp.allclose(out_general, ref, atol=1e-4, rtol=1e-5)

    print("KERNEL_OK")
</pallas_src>

<mosaic_0001>
module attributes {stable_mosaic.version = 11 : i64} {
  func.func @_uniform_entropy_kernel(%arg0: i32, %arg1: memref<2x8x32xf32, #tpu.memory_space<vmem>>, %arg2: memref<2x8xf32, #tpu.memory_space<vmem>>) attributes {dimension_semantics = [#tpu.dimension_semantics<parallel>], iteration_bounds = array<i64: 1>, scalar_prefetch = 0 : i64, scratch_operands = 0 : i64, tpu.core_type = #tpu.core_type<tc>, window_params = [{transform_indices = @transform_0, window_bounds = array<i64: 2, 8, 32>}, {transform_indices = @transform_1, window_bounds = array<i64: 2, 8>}]} {
    %c0 = arith.constant 0 : index
    %c0_0 = arith.constant 0 : index
    %c0_1 = arith.constant 0 : index
    %0 = vector.load %arg1[%c0, %c0_0, %c0_1] : memref<2x8x32xf32, #tpu.memory_space<vmem>>, vector<2x8x32xf32>
    %cst = arith.constant dense<0.000000e+00> : vector<2x8xf32>
    %1 = vector.multi_reduction <add>, %0, %cst [2] : vector<2x8x32xf32> to vector<2x8xf32>
    %cst_2 = arith.constant 3.46573591 : f32
    %2 = vector.broadcast %cst_2 : f32 to vector<2x8xf32>
    %3 = arith.mulf %1, %2 : vector<2x8xf32>
    %c0_3 = arith.constant 0 : index
    %c0_4 = arith.constant 0 : index
    %4 = vector.load %arg2[%c0_3, %c0_4] : memref<2x8xf32, #tpu.memory_space<vmem>>, vector<2x8xf32>
    tpu.vector_store %arg2[%c0_3, %c0_4], %3 {strides = array<i32>} : memref<2x8xf32, #tpu.memory_space<vmem>>, vector<2x8xf32>,
    return
  }
  func.func @transform_0(%arg0: i32) -> (i32, i32, i32) {
    %c0_i32 = arith.constant 0 : i32
    %c0_i32_0 = arith.constant 0 : i32
    %c0_i32_1 = arith.constant 0 : i32
    return %arg0, %c0_i32, %c0_i32_0 : i32, i32, i32
  }
  func.func @transform_1(%arg0: i32) -> (i32, i32) {
    %c0_i32 = arith.constant 0 : i32
    %c0_i32_0 = arith.constant 0 : i32
    return %arg0, %c0_i32 : i32, i32
  }
}

</mosaic_0001>

<bundles_post_ra>
// kernel: tpu_custom_call.1
= control target key start
LH: loop header
LB: loop body
LE: loop exit
PB: predicated region body
PF: predicated region fallthrough
CT: control target
= control target key end

     0   :  { %6 = vsyncpa [#allocation3], 0  ;;  %s140_s0 = inlined_call_operand.hbm [shape: f32[2,8,32], index: 0, kind: input, shape index: {}]   ;;  %s141_s1 = inlined_call_operand.hbm [shape: f32[2,8], index: 1, kind: output, shape index: {}]  }
   0x1   :  { %7 = vsyncpa [#allocation4], 0  ;;  %s12_s8 = sshll.u32 %s140_s0, 4  ;;  %s120_s9 = smov [#allocation2]   ;;  %s13_s8 = int_to_ptr.hbm [resolvable:$true] %s12_s8 }
   0x2   :  { %s14_s10 = sshll.u32 %s120_s9, 4  ;;  %s121_s11 = smov 128   ;;  %s15_s10 = int_to_ptr.vmem [resolvable:$true] %s14_s10 }
   0x3   :  { %s122_s12 = smov 8  }
   0x4   :  { %20 = dma.hbm_to_vmem [thread:$0]  %s13_s8, 256, %s15_s10, [#allocation3], %s121_s11, %s121_s11, %s122_s12  }
   0x5   :  { %116 = dma.done.wait [#allocation3], 256  }
   0x6   :  { %117 = vsyncadd [#allocation3], 4294967040  ;;  %vm27_vm0 = vcmask 261120   ;;  %v25_v0 = vld [vmem:[#allocation2] sm:$0xff]  ;;  %v26_v2 = vld [vmem:[#allocation2 + $0x8] sm:$0xff]  ;;  %v38_v5 = vlaneseq  ;;  %s123_s0 = smov [#allocation5]  }
   0x7   :  { %v28_v1 = vsel %vm27_vm0, %v25_v0, 0.0  ;;  %v31_v3 = vsel %vm27_vm0, %v26_v2, 0.0  ;;  %s52_s13 = sshll.u32 %s123_s0, 4  ;;  %s54_s16 = sshll.u32 %s141_s1, 4  ;;  %vm42_vm1 = vcmask 1041409   ;;  %vm45_vm2 = vcmask 58368   ;;  %s53_s13 = int_to_ptr.vmem [resolvable:$true] %s52_s13  ;;  %s55_s16 = int_to_ptr.hbm [resolvable:$true] %s54_s16 }
   0x8   :  { %29 = vadd.xlane.f32.xlu0 %v28_v1  ;;  %v39_v6 = vand.u32 127, %v38_v5 }
  0x10   :  { %32 = vadd.xlane.f32.xlu0 %v31_v3 }
  0x7b   :  { %v30_v4 = vpop.xlane.xlu0 %29 }
  0x7c   :  { %v34_v7 = vmul.f32 3.465736, %v30_v4 }
  0x7e   :  { %v40_v10 = vperm.slane %v34_v7, %v39_v6 }
  0x83   :  { %v33_v8 = vpop.xlane.xlu0 %32 }
  0x84   :  { %v35_v9 = vmul.f32 3.465736, %v33_v8 }
  0x86   :  { %v41_v11 = vperm.slane %v35_v9, %v39_v6 }
  0x88   :  { %v43_v12 = vsel %vm42_vm1, %v41_v11, %v40_v10 }
  0x89   :  { %46 = vst.msk [vmem:[#allocation5] sm:$0x3] %vm45_vm2, %v43_v12 }
  0x8a   :  { %57 = dma.vmem_to_hbm [thread:$0]  %s53_s13, 32, %s55_s16, [#allocation4]  }
  0x8b   :  { %118 = dma.done.wait [#allocation4], 32  }
  0x8c   :  { %119 = vsyncadd [#allocation4], 4294967264 }
  0x8d   :  { %62 = vsyncpa [#allocation3], 1 }
  0x8e   :  { %63 = vsyncpa [#allocation4], 1 }

</bundles_post_ra>
